<compile_context>
chip_gen: v7x
topology: tpu7x:2x2x1
jax: 0.10.0
libtpu: 0.0.40
codegen_flags: <defaults>
</compile_context>

<pallas_src>
import functools

import jax
import jax.numpy as jnp
import numpy as np
from jax.experimental import pallas as pl
from jax.experimental.pallas import tpu as pltpu


def _round_up(x, m):
    return ((x + m - 1) // m) * m


def _ce_action_loss_kernel(yhat_ref, y_ref, out_ref, *, n_batch, tile_b,
                           sel_dim, x_dim, w_sel, w_x, w_y):
    """One (TB, S, A) batch-tile, straight from the original (B, S, A) layout.

    yhat_ref, y_ref : (TB, S, A)  logits / soft targets (seq = class axis = 1)
    out_ref         : (1, 8, 128) per-tile partial-sum block; wrapper reads [:,0,0]
    """
    yh = yhat_ref[...].astype(jnp.float32)              # (TB, S, A)
    yt = y_ref[...].astype(jnp.float32)                 # (TB, S, A)

    # Stable log-sum-exp over the seq axis (PyTorch class dim=1 for 3-D input).
    m = jnp.max(yh, axis=1, keepdims=True)               # (TB, 1, A)
    z = yh - m                                           # (TB, S, A)
    lse = jnp.log(jnp.sum(jnp.exp(z), axis=1))           # (TB, A)

    # Soft-target CE per (b, a): -sum_s yt*(z - lse) = sy*lse - sum_s(yt*z).
    syz = jnp.sum(yt * z, axis=1)                        # (TB, A)
    sy = jnp.sum(yt, axis=1)                             # (TB, A)
    per = sy * lse - syz                                 # (TB, A)

    # Per-action weight folds the 1/(B*C_sub) mean of each CE sub-loss; the
    # batch mask drops garbage rows of a ragged last tile (must be jnp.where,
    # not a zero weight, since garbage may be NaN/Inf).
    shp = per.shape
    a_idx = jax.lax.broadcasted_iota(jnp.int32, shp, 1)
    b_idx = pl.program_id(0) * tile_b + jax.lax.broadcasted_iota(jnp.int32, shp, 0)
    w = jnp.where(a_idx < sel_dim, w_sel,
                  jnp.where(a_idx < sel_dim + x_dim, w_x, w_y))
    contrib = jnp.where(b_idx < n_batch, w * per, 0.0)

    partial = jnp.sum(contrib)
    out_ref[...] = jnp.full(out_ref.shape, partial, out_ref.dtype)


def tenten_ce_action_loss(y_hat, y, block_selection_dim=3, x_dim=10,
                          vmem_budget_bytes=32 * 1024 * 1024):
    """y_hat, y: (B, S, A) floats (any float dtype). Returns scalar f32 loss."""
    B, S, A = y_hat.shape
    assert y.shape == y_hat.shape
    y_dim = A - block_selection_dim - x_dim
    assert y_dim > 0

    # Adaptive batch tile: the VMEM tile is padded to (sublane=8, lane=128),
    # so budget with padded dims.  Footprint per batch element =
    #   2 inputs x 2 pipeline buffers (input dtype) + ~4 tile-sized f32 temps.
    itemsize = jnp.dtype(y_hat.dtype).itemsize
    per_b_vmem = _round_up(S, 8) * _round_up(A, 128) * (2 * 2 * itemsize + 4 * 4)
    TB = int(max(1, min(B, vmem_budget_bytes // per_b_vmem)))
    if B >= 2:
        # Keep >= 2 grid steps so both v7x TensorCores get work (harmless on
        # single-TC v5e/v6e; per-step overhead ~0.35 us is negligible here).
        TB = min(TB, -(-B // 2))
    num_tiles = -(-B // TB)
    # TODO(synk): sequences so long that even TB=1 exceeds the VMEM budget
    # would need an online-LSE split over the seq axis; not implemented.

    kernel = functools.partial(
        _ce_action_loss_kernel,
        n_batch=B, tile_b=TB,
        sel_dim=block_selection_dim, x_dim=x_dim,
        w_sel=1.0 / (B * block_selection_dim),
        w_x=1.0 / (B * x_dim),
        w_y=1.0 / (B * y_dim),
    )

    partials = pl.pallas_call(
        kernel,
        out_shape=jax.ShapeDtypeStruct((num_tiles, 8, 128), jnp.float32),
        grid=(num_tiles,),
        in_specs=[
            pl.BlockSpec((TB, S, A), lambda i: (i, 0, 0)),
            pl.BlockSpec((TB, S, A), lambda i: (i, 0, 0)),
        ],
        out_specs=pl.BlockSpec((1, 8, 128), lambda i: (i, 0, 0)),
        compiler_params=pltpu.CompilerParams(
            dimension_semantics=("parallel",),       # megacore on v7x
            vmem_limit_bytes=48 * 1024 * 1024,       # fits v7x's 64 MiB/TC
        ),
    )(y_hat, y)

    # Each tile's partial lives at [i, 0, 0]; summing them gives the loss.
    return jnp.sum(partials[:, 0, 0])


def _reference_loss(y_hat, y, block_selection_dim=3, x_dim=10):
    """Pure-JAX reference with the same (PyTorch-exact) semantics."""
    def ce(logits, target):
        # logits/target: (B, S, C_sub); class dim = 1 (seq), soft targets.
        logsm = jax.nn.log_softmax(logits.astype(jnp.float32), axis=1)
        per = -jnp.sum(target.astype(jnp.float32) * logsm, axis=1)   # (B, C_sub)
        return jnp.mean(per)

    a, b = block_selection_dim, block_selection_dim + x_dim
    return (ce(y_hat[..., :a], y[..., :a])
            + ce(y_hat[..., a:b], y[..., a:b])
            + ce(y_hat[..., b:], y[..., b:]))


if __name__ == "__main__":
    # 1010! action vector = 3 (block selection) + 10 (x) + 10 (y) = 23.
    B, S, A = 2, 8, 23
    key = jax.random.PRNGKey(0)
    k1, k2, k3, k4 = jax.random.split(key, 4)
    y_hat = jax.random.normal(k1, (B, S, A), dtype=jnp.float32)
    y_tgt = jax.random.uniform(k2, (B, S, A), dtype=jnp.float32)

    ref = jax.block_until_ready(_reference_loss(y_hat, y_tgt))
    loss = jax.block_until_ready(tenten_ce_action_loss(y_hat, y_tgt))
    np.testing.assert_allclose(np.asarray(loss), np.asarray(ref),
                               rtol=1e-5, atol=1e-5)

    # Ragged last batch tile (B=3 with TB=2) exercises the in-kernel mask.
    B2, S2 = 3, 16
    yh2 = jax.random.normal(k3, (B2, S2, A), dtype=jnp.float32)
    yt2 = jax.random.uniform(k4, (B2, S2, A), dtype=jnp.float32)
    ref2 = jax.block_until_ready(_reference_loss(yh2, yt2))
    loss2 = jax.block_until_ready(tenten_ce_action_loss(yh2, yt2))
    np.testing.assert_allclose(np.asarray(loss2), np.asarray(ref2),
                               rtol=1e-5, atol=1e-5)

    # bf16 inputs go straight into the kernel (halves HBM read traffic);
    # in-kernel math is f32, so it matches an f32 reference on the same values.
    yh_bf = y_hat.astype(jnp.bfloat16)
    yt_bf = y_tgt.astype(jnp.bfloat16)
    ref_bf = jax.block_until_ready(
        _reference_loss(yh_bf.astype(jnp.float32), yt_bf.astype(jnp.float32)))
    loss_bf = jax.block_until_ready(tenten_ce_action_loss(yh_bf, yt_bf))
    np.testing.assert_allclose(np.asarray(loss_bf), np.asarray(ref_bf),
                               rtol=1e-5, atol=1e-5)

    print("KERNEL_OK")
</pallas_src>

<mosaic_0001>
module attributes {stable_mosaic.version = 11 : i64} {
  func.func @_ce_action_loss_kernel(%arg0: i32, %arg1: memref<1x8x23xf32, #tpu.memory_space<vmem>>, %arg2: memref<1x8x23xf32, #tpu.memory_space<vmem>>, %arg3: memref<1x8x128xf32, #tpu.memory_space<vmem>>) attributes {dimension_semantics = [#tpu.dimension_semantics<parallel>], iteration_bounds = array<i64: 2>, scalar_prefetch = 0 : i64, scratch_operands = 0 : i64, tpu.core_type = #tpu.core_type<tc>, window_params = [{transform_indices = @transform_0, window_bounds = array<i64: 1, 8, 23>}, {transform_indices = @transform_1, window_bounds = array<i64: 1, 8, 23>}, {transform_indices = @transform_2, window_bounds = array<i64: 1, 8, 128>}]} {
    %c0 = arith.constant 0 : index
    %c0_0 = arith.constant 0 : index
    %c0_1 = arith.constant 0 : index
    %0 = vector.load %arg1[%c0, %c0_0, %c0_1] : memref<1x8x23xf32, #tpu.memory_space<vmem>>, vector<1x8x23xf32>
    %c0_2 = arith.constant 0 : index
    %c0_3 = arith.constant 0 : index
    %c0_4 = arith.constant 0 : index
    %1 = vector.load %arg2[%c0_2, %c0_3, %c0_4] : memref<1x8x23xf32, #tpu.memory_space<vmem>>, vector<1x8x23xf32>
    %cst = arith.constant dense<0xFF800000> : vector<1x23xf32>
    %2 = vector.multi_reduction <maximumf>, %0, %cst [1] : vector<1x8x23xf32> to vector<1x23xf32>
    %3 = vector.shape_cast %2 : vector<1x23xf32> to vector<1x1x23xf32>
    %4 = vector.broadcast %3 : vector<1x1x23xf32> to vector<1x8x23xf32>
    %5 = arith.subf %0, %4 : vector<1x8x23xf32>
    %6 = math.exp %5 : vector<1x8x23xf32>
    %cst_5 = arith.constant dense<0.000000e+00> : vector<1x23xf32>
    %7 = vector.multi_reduction <add>, %6, %cst_5 [1] : vector<1x8x23xf32> to vector<1x23xf32>
    %8 = math.log %7 : vector<1x23xf32>
    %9 = arith.mulf %1, %5 : vector<1x8x23xf32>
    %cst_6 = arith.constant dense<0.000000e+00> : vector<1x23xf32>
    %10 = vector.multi_reduction <add>, %9, %cst_6 [1] : vector<1x8x23xf32> to vector<1x23xf32>
    %cst_7 = arith.constant dense<0.000000e+00> : vector<1x23xf32>
    %11 = vector.multi_reduction <add>, %1, %cst_7 [1] : vector<1x8x23xf32> to vector<1x23xf32>
    %12 = arith.mulf %11, %8 : vector<1x23xf32>
    %13 = arith.subf %12, %10 : vector<1x23xf32>
    %14 = tpu.iota {dimensions = array<i32: 1>} : vector<1x23xi32>
    %c1_i32 = arith.constant 1 : i32
    %15 = arith.muli %arg0, %c1_i32 : i32
    %16 = tpu.iota {dimensions = array<i32: 0>} : vector<1x23xi32>
    %17 = vector.broadcast %15 : i32 to vector<1x23xi32>
    %18 = arith.addi %17, %16 : vector<1x23xi32>
    %c3_i32 = arith.constant 3 : i32
    %19 = vector.broadcast %c3_i32 : i32 to vector<1x23xi32>
    %20 = arith.cmpi slt, %14, %19 : vector<1x23xi32>
    %c13_i32 = arith.constant 13 : i32
    %21 = vector.broadcast %c13_i32 : i32 to vector<1x23xi32>
    %22 = arith.cmpi slt, %14, %21 : vector<1x23xi32>
    %cst_8 = arith.constant 5.000000e-02 : f32
    %cst_9 = arith.constant 5.000000e-02 : f32
    %23 = vector.broadcast %cst_8 : f32 to vector<1x23xf32>
    %24 = vector.broadcast %cst_9 : f32 to vector<1x23xf32>
    %25 = arith.select %22, %23, %24 : vector<1x23xi1>, vector<1x23xf32>
    %cst_10 = arith.constant 0.166666672 : f32
    %26 = vector.broadcast %cst_10 : f32 to vector<1x23xf32>
    %27 = arith.select %20, %26, %25 : vector<1x23xi1>, vector<1x23xf32>
    %c2_i32 = arith.constant 2 : i32
    %28 = vector.broadcast %c2_i32 : i32 to vector<1x23xi32>
    %29 = arith.cmpi slt, %18, %28 : vector<1x23xi32>
    %30 = arith.mulf %27, %13 : vector<1x23xf32>
    %cst_11 = arith.constant 0.000000e+00 : f32
    %31 = vector.broadcast %cst_11 : f32 to vector<1x23xf32>
    %32 = arith.select %29, %30, %31 : vector<1x23xi1>, vector<1x23xf32>
    %33 = vector.shape_cast %32 : vector<1x23xf32> to vector<1x1x23xf32>
    %cst_12 = arith.constant dense<0.000000e+00> : vector<1xf32>
    %34 = vector.multi_reduction <add>, %33, %cst_12 [1, 2] : vector<1x1x23xf32> to vector<1xf32>
    %35 = vector.shape_cast %34 : vector<1xf32> to vector<1x1x1xf32>
    %36 = vector.extract %35[0, 0, 0] : f32 from vector<1x1x1xf32>
    %37 = vector.broadcast %36 : f32 to vector<1x8x128xf32>
    %c0_13 = arith.constant 0 : index
    %c0_14 = arith.constant 0 : index
    %c0_15 = arith.constant 0 : index
    %38 = vector.load %arg3[%c0_13, %c0_14, %c0_15] : memref<1x8x128xf32, #tpu.memory_space<vmem>>, vector<1x8x128xf32>
    tpu.vector_store %arg3[%c0_13, %c0_14, %c0_15], %37 {strides = array<i32>} : memref<1x8x128xf32, #tpu.memory_space<vmem>>, vector<1x8x128xf32>,
    return
  }
  func.func @transform_0(%arg0: i32) -> (i32, i32, i32) {
    %c0_i32 = arith.constant 0 : i32
    %c0_i32_0 = arith.constant 0 : i32
    %c0_i32_1 = arith.constant 0 : i32
    return %arg0, %c0_i32, %c0_i32_0 : i32, i32, i32
  }
  func.func @transform_1(%arg0: i32) -> (i32, i32, i32) {
    %c0_i32 = arith.constant 0 : i32
    %c0_i32_0 = arith.constant 0 : i32
    %c0_i32_1 = arith.constant 0 : i32
    return %arg0, %c0_i32, %c0_i32_0 : i32, i32, i32
  }
  func.func @transform_2(%arg0: i32) -> (i32, i32, i32) {
    %c0_i32 = arith.constant 0 : i32
    %c0_i32_0 = arith.constant 0 : i32
    %c0_i32_1 = arith.constant 0 : i32
    return %arg0, %c0_i32, %c0_i32_0 : i32, i32, i32
  }
}

</mosaic_0001>

<bundles_post_ra>
// kernel: tpu_custom_call.1
= control target key start
LH: loop header
LB: loop body
LE: loop exit
PB: predicated region body
PF: predicated region fallthrough
CT: control target
= control target key end

     0   :  { %7 = vsyncpa [#allocation3], 0  ;;  %s809_s0 = inlined_call_operand.hbm [shape: f32[2,8,23], index: 0, kind: input, shape index: {}]   ;;  %s810_s1 = inlined_call_operand.hbm [shape: f32[2,8,23], index: 1, kind: input, shape index: {}]   ;;  %s811_s2 = inlined_call_operand.hbm [shape: f32[2,8,128], index: 2, kind: output, shape index: {}]  }
   0x1   :  { %9 = vsyncpa [#allocation3 + $0x1], 0 }
   0x2   :  { %10 = vsyncpa [#allocation6], 0 }
   0x3   :  { %12 = vsyncpa [#allocation6 + $0x1], 0 }
   0x4   :  { %13 = vsyncpa [#allocation4], 0 }
   0x5   :  { %15 = vsyncpa [#allocation4 + $0x1], 0  ;;  %s590_s9 = smov 0   ;;  %s592_s10 = smov 0  }
   0x6   :  { %s594_s11 = smov 0   ;;  %s596_s12 = smov 0  }
   0x7 LB: > { %s611_s13 = sadd.s32 4294967295, %s569_s12   ;;  %s366_s14 = sadd.s32 4294967294, %s569_s12   ;;  %s569_s12 = sphi %s596_s12, %s830_s12   ;;  %s565_s11 = sphi %s594_s11, %s829_s11   ;;  %s561_s10 = sphi %s592_s10, %s828_s10   ;;  %s557_s9 = sphi %s590_s9, %s827_s9  }
   0x8   : > { %s615_s15 = sadd.s32 1, %s569_s12   ;;  %s28_s16 = sadd.s32 1, %s565_s11 }
   0x9   : > { %s25_s17 = ssub.s32 %s569_s12, %s615_s15  ;;  %p35_p0 = scmp.ne.s32.totalorder %s565_s11, %s561_s10 }
   0xa   : > { %p26_p1 = scmp.eq.s32.totalorder %s25_s17, 0  ;;  %p36_p2 = scmp.eq.s32.totalorder %s569_s12, 0 }
   0xb   : > { %p41_p3 = scmp.ne.s32.totalorder %s561_s10, %s557_s9  ;;  %p42_p4 = scmp.eq.s32.totalorder %s611_s13, 0 }
   0xc   : > { %s627_s18 = scalar_select %p26_p1, %s565_s11, %s28_s16  }
   0xd   : > { %p629_p5 = por %p36_p2, %p35_p0  ;;  %p633_p6 = por %p42_p4, %p41_p3 }
   0xe   : > { %p91_p7 = scmp.eq.s32.totalorder %s611_s13, 1  ;;  %p97_p8 = scmp.eq.s32.totalorder %s366_s14, 1 }
   0xf   : > { %s815_s20 = scalar_select %p633_p6, 1, 0 }
  0x10   : > { %p400_p10 = scmp.lt.s32.totalorder %s569_s12, 2  ;;  %p640_p11 = por %p91_p7, %p35_p0 }
  0x11   : > { %p644_p12 = por %p97_p8, %p41_p3  ;;  %s649_s23 = sand.u32 1, %s565_s11  }
  0x12   : > { %s816_s21 = scalar_select %p640_p11, 1, 0 }
  0x13   : > { %s817_s22 = scalar_select %p644_p12, 1, 0 }
  0x14   : > { %s370_s24 = sshll.u32 %s569_s12, 7  ;;  %s369_s25 = sshll.u32 %s649_s23, 3 }
  0x15   : > { %s658_s28 = scalar_lea.hbm %s809_s0, %s370_s24  ;;  %s121_s29 = scalar_lea.vmem [#allocation2], %s369_s25 }
  0x16   : > { %s128_s30 = sshll.u32 %s121_s29, 4  ;;  %p664_p13 = pnand %p400_p10, %p629_p5  ;;  %s668_s30 = int_to_ptr.vmem [resolvable:$true] %s128_s30 }
  0x17   : > { %s118_s4 = scalar_lea.sflag [#allocation3], %s649_s23  ;;  %s439_s5 = scalar_lea.hbm %s658_s28, 128 }
  0x18   : > { %p440_p2 = scmp.ne.s32.totalorder %s658_s28, %s439_s5  ;;  %p441_p3 = pneg %p664_p13 }
  0x19   : > { %s444_s8 = scalar_lea.hbm %s809_s0, 256  ;;  %p445_p5 = scmp.lt.u32.totalorder %s658_s28, %s809_s0 }
  0x1a   : > { %p442_p4 = pnand %p441_p3, %p440_p2  ;;  %p446_p8 = scmp.lt.u32.totalorder %s444_s8, %s439_s5 }
  0x1b   : > { %p448_p9 = scmp.lt.u32.totalorder %s439_s5, %s658_s28 }
  0x1c   : > { %p443_p7 = pneg %p442_p4  ;;  %p447_p10 = por %p446_p8, %p445_p5 }
  0x1e   : > { %p449_p0 = por %p448_p9, %p447_p10 }
  0x20   : > { %p450_p1 = pnand %p449_p0, %p443_p7 }
  0x22   : > { %453 = shalt.err (!%p450_p1)
}
  0x23   : > { %s454_s17 = scalar_lea.vmem %s668_s30, 128  ;;  %s571_s19 = smov [#allocation2]  }
  0x24   : > { %p455_p2 = scmp.ne.s32.totalorder %s668_s30, %s454_s17  ;;  %s459_s26 = sshll.u32 %s571_s19, 4  ;;  %s460_s26 = int_to_ptr.vmem [resolvable:$false] %s459_s26 }
  0x25   : > { %s461_s27 = scalar_lea.vmem %s460_s26, 256  ;;  %p462_p11 = scmp.lt.s32.totalorder %s668_s30, %s460_s26 }
  0x26   : > { %p457_p4 = pnand %p455_p2, %p441_p3  ;;  %p463_p5 = scmp.lt.s32.totalorder %s461_s27, %s454_s17 }
  0x28   : > { %p458_p12 = pneg %p457_p4  ;;  %p464_p8 = por %p463_p5, %p462_p11 }
  0x2a   : > { %p465_p9 = pnand %p464_p8, %p458_p12 }
  0x2c   : > { %468 = shalt.err (!%p465_p9)
}
  0x2d   : > { %392 = dma.hbm_to_vmem [thread:$0]  (!%p664_p13), %s658_s28, 128, %s668_s30, %s118_s4  }
  0x2e   : > { %p819_p0 = scmp.lt.s32.totalorder %s569_s12, 3  ;;  %p820_p1 = scmp.ge.s32.totalorder %s569_s12, 1 }
  0x2f   : > { %s711_s7 = scalar_lea.hbm %s810_s1, %s370_s24  ;;  %s139_s8 = scalar_lea.vmem [#allocation5], %s369_s25 }
  0x30   : > { %p702_p7 = pnand %p820_p1, %p819_p0  ;;  %s146_s14 = sshll.u32 %s139_s8, 4  ;;  %s147_s14 = int_to_ptr.vmem [resolvable:$true] %s146_s14 }
  0x31   : > { %s136_s28 = scalar_lea.sflag [#allocation6], %s649_s23  ;;  %s469_s30 = scalar_lea.hbm %s711_s7, 128 }
  0x32   : > { %s821_s29 = scalar_select %p702_p7, 1, 0 }
  0x33   : > { %p470_p11 = scmp.ne.s32.totalorder %s711_s7, %s469_s30  ;;  %s474_s24 = scalar_lea.hbm %s810_s1, 256 }
  0x34   : > { %p475_p2 = scmp.lt.u32.totalorder %s711_s7, %s810_s1  ;;  %p476_p4 = scmp.lt.u32.totalorder %s474_s24, %s469_s30 }
  0x35   : > { %p472_p12 = pnand %p470_p11, %p441_p3  ;;  %p478_p8 = scmp.lt.u32.totalorder %s469_s30, %s711_s7 }
  0x36   : > { %p477_p5 = por %p476_p4, %p475_p2 }
  0x37   : > { %p473_p10 = pneg %p472_p12 }
  0x38   : > { %p479_p9 = por %p478_p8, %p477_p5 }
  0x3a   : > { %p480_p0 = pnand %p479_p9, %p473_p10 }
  0x3c   : > { %483 = shalt.err (!%p480_p0)
}
  0x3d   : > { %s484_s23 = scalar_lea.vmem %s147_s14, 128  ;;  %s572_s25 = smov [#allocation5]  }
  0x3e   : > { %p485_p1 = scmp.ne.s32.totalorder %s147_s14, %s484_s23  ;;  %s489_s26 = sshll.u32 %s572_s25, 4  ;;  %s490_s26 = int_to_ptr.vmem [resolvable:$false] %s489_s26 }
  0x3f   : > { %s491_s27 = scalar_lea.vmem %s490_s26, 256  ;;  %p492_p6 = scmp.lt.s32.totalorder %s147_s14, %s490_s26 }
  0x40   : > { %p487_p11 = pnand %p485_p1, %p441_p3  ;;  %p493_p7 = scmp.lt.s32.totalorder %s491_s27, %s484_s23 }
  0x42   : > { %p488_p12 = pneg %p487_p11  ;;  %p494_p2 = por %p493_p7, %p492_p6 }
  0x44   : > { %p495_p4 = pnand %p494_p2, %p488_p12 }
  0x46   : > { %498 = shalt.err (!%p495_p4)
}
  0x47   : > { %395 = dma.hbm_to_vmem [thread:$0]  (!%p664_p13), %s711_s7, 128, %s147_s14, %s136_s28  }
  0x48   : > { %p822_p10 = scmp.ne.s32.totalorder %s821_s29, 0 }
  0x49   : > { %s738_s5 = sand.u32 (!%p822_p10), 1, %s561_s10   ;;  %p823_p6 = scmp.ne.s32.totalorder (!%p822_p10), %s815_s20, 0 }
  0x4a   : > { %155 = sbr.rel (%p822_p10) target bundleno = 366 (0x16e), region = 28  ;;  %s741_s6 = sshll.u32 (!%p822_p10), %s738_s5, 3 }
  0x4b   : > { %s158_s8 = scalar_lea.sflag (!%p822_p10), [#allocation3], %s738_s5  ;;  %s161_s30 = scalar_lea.vmem (!%p822_p10), [#allocation2], %s741_s6 }
  0x51   : > { %544 = dma.done.wait (%p823_p6), %s158_s8, 128  }
  0x52   : > { %546 = vsyncadd (%p823_p6), %s158_s8, 4294967168  ;;  %s167_s3 = scalar_lea.sflag [#allocation6], %s738_s5  ;;  %s170_s29 = scalar_lea.vmem [#allocation5], %s741_s6 }
  0x53   : > { %548 = dma.done.wait (%p823_p6), %s167_s3, 128  }
  0x54   : > { %550 = vsyncadd (%p823_p6), %s167_s3, 4294967168  ;;  %vm198_vm0 = vcmask 187392   ;;  %v196_v0 = vld [vmem:[%s161_s30] sm:$0xff]  ;;  %v197_v10 = vld [vmem:[%s170_s29] sm:$0xff]  ;;  %v235_v30 = vlaneseq  ;;  %v239_v36 = vstv %s611_s13  ;;  %v573_v42 = vmov 0.05  }
  0x55   : > { %v199_v1 = vsel %vm198_vm0, %v196_v0, -inf  ;;  %v226_v13 = vsel %vm198_vm0, %v197_v10, 0.0  ;;  %vm246_vm3 = vcmask 180224   ;;  %s195_s20 = scalar_lea.vmem [#allocation7], %s741_s6  ;;  %s378_s14 = sshll.u32 %s611_s13, 7 }
  0x56   : > { %v200_v2 = vrot.slane %v199_v1, 4  ;;  %v227_v17 = vrot.slane %v226_v13, 4  ;;  %v236_v33 = vand.u32 127, %v235_v30  ;;  %v238_v34 = vshrl.u32 %v235_v30, 7  ;;  %s273_s7 = sshll.u32 %s195_s20, 4  ;;  %s767_s24 = scalar_lea.hbm %s811_s2, %s378_s14  ;;  %s762_s7 = int_to_ptr.vmem [resolvable:$true] %s273_s7 }
  0x57   : > { %s260_s17 = scalar_lea.sflag [#allocation4], %s738_s5  ;;  %s499_s19 = scalar_lea.vmem %s762_s7, 128 }
  0x58   : > { %v201_v3 = vmax.f32 %v199_v1, %v200_v2  ;;  %v228_v21 = vadd.f32 %v227_v17, %v226_v13  ;;  %vm241_vm1 = vcmp.lt.s32.totalorder %v236_v33, 3  ;;  %v240_v40 = vadd.s32 %v239_v36, %v238_v34  ;;  %p500_p13 = scmp.ne.s32.totalorder %s762_s7, %s499_s19  ;;  %p824_p3 = scmp.ne.s32.totalorder %s816_s21, 0 }
  0x59   : > { %v242_v43 = vsel %vm241_vm1, 0.16666667, %v573_v42  ;;  %s574_s13 = smov [#allocation7]  }
  0x5a   : > { %v202_v4 = vrot.slane %v201_v3, 2  ;;  %v229_v25 = vrot.slane %v228_v21, 2  ;;  %vm243_vm2 = vcmp.lt.s32.totalorder %v240_v40, 2  ;;  %p501_p7 = pnand %p500_p13, %p824_p3  ;;  %s503_s23 = sshll.u32 %s574_s13, 4  ;;  %s504_s23 = int_to_ptr.vmem [resolvable:$false] %s503_s23 }
  0x5b   : > { %s505_s25 = scalar_lea.vmem %s504_s23, 256  ;;  %p506_p8 = scmp.lt.s32.totalorder %s762_s7, %s504_s23 }
  0x5c   : > { %v203_v5 = vmax.f32 %v201_v3, %v202_v4  ;;  %v230_v28 = vadd.f32 %v229_v25, %v228_v21  ;;  %p502_p5 = pneg %p501_p7  ;;  %p507_p9 = scmp.lt.s32.totalorder %s505_s25, %s499_s19 }
  0x5e   : > { %v204_v6 = vrot.slane %v203_v5, 1  ;;  %v231_v31 = vrot.slane %v230_v28, 1  ;;  %p508_p0 = por %p507_p9, %p506_p8 }
  0x60   : > { %v205_v7 = vmax.f32 %v203_v5, %v204_v6  ;;  %v232_v35 = vadd.f32 %v231_v31, %v230_v28  ;;  %p509_p1 = pnand %p508_p0, %p502_p5 }
  0x62   : > { %v206_v8 = vsub.f32 %v196_v0, %v205_v7 }
  0x64   : > { %v207_v9 = vmul.f32 1.442695, %v206_v8  ;;  %v218_v11 = vmul.f32 %v206_v8, %v197_v10 }
  0x66   : > { %435 = vpow2.f32 %v207_v9  ;;  %v219_v16 = vsel %vm198_vm0, %v218_v11, 0.0 }
  0x67   : > { %v220_v19 = vrot.slane %v219_v16, 4 }
  0x69   : > { %v221_v23 = vadd.f32 %v220_v19, %v219_v16 }
  0x6b   : > { %v222_v27 = vrot.slane %v221_v23, 2 }
  0x6d   : > { %v223_v29 = vadd.f32 %v222_v27, %v221_v23 }
  0x6f   : > { %v224_v32 = vrot.slane %v223_v29, 1 }
  0x70   : > { %v436_v12 = vpop.eup %435 }
  0x71   : > { %v209_v14 = vsel %vm198_vm0, %v436_v12, 0.0  ;;  %v225_v39 = vadd.f32 %v224_v32, %v223_v29 }
  0x72   : > { %v210_v15 = vrot.slane %v209_v14, 4 }
  0x74   : > { %v211_v18 = vadd.f32 %v210_v15, %v209_v14 }
  0x76   : > { %v212_v20 = vrot.slane %v211_v18, 2 }
  0x78   : > { %v213_v22 = vadd.f32 %v212_v20, %v211_v18 }
  0x7a   : > { %v214_v24 = vrot.slane %v213_v22, 1 }
  0x7c   : > { %v215_v26 = vadd.f32 %v214_v24, %v213_v22 }
  0x7e   : > { %437 = vlog2.f32 %v215_v26 }
  0x88   : > { %v438_v37 = vpop.eup %437 }
  0x89   : > { %v217_v38 = vmul.f32 0.6931472, %v438_v37 }
  0x8b   : > { %v233_v41 = vmul.f32 %v232_v35, %v217_v38 }
  0x8d   : > { %v234_v44 = vsub.f32 %v233_v41, %v225_v39 }
  0x8f   : > { %v244_v45 = vmul.f32 %v242_v43, %v234_v44 }
  0x91   : > { %v245_v46 = vsel %vm243_vm2, %v244_v45, 0.0 }
  0x92   : > { %v247_v47 = vsel %vm246_vm3, %v245_v46, 0.0 }
  0x93   : > { %248 = vadd.xlane.f32.xlu0 %v247_v47 }
 0x120   : > { %v249_v48 = vpop.xlane.xlu0 %248 }
 0x121   : > { %v250_v49 = vrot.slane %v249_v48, 4 }
 0x123   : > { %v251_v50 = vadd.f32 %v250_v49, %v249_v48 }
 0x125   : > { %v252_v51 = vrot.slane %v251_v50, 2 }
 0x127   : > { %v253_v52 = vadd.f32 %v252_v51, %v251_v50 }
 0x129   : > { %v254_v53 = vrot.slane %v253_v52, 1 }
 0x12b   : > { %v255_v54 = vadd.f32 %v254_v53, %v253_v52 }
 0x12d   : > { %381 = vpush %v255_v54 }
 0x15e   : > { %s382_s28 = spop %381 }
 0x15f   : > { %v257_v55 = vstv %s382_s28 }
 0x160   : > { %258 = vst [vmem:[%s195_s20] sm:$0xff] %v257_v55 }
 0x161   : > { %512 = shalt.err (!%p509_p1)
}
 0x162   : > { %s513_s26 = scalar_lea.hbm %s767_s24, 128  ;;  %s517_s6 = scalar_lea.hbm %s811_s2, 256 }
 0x163   : > { %p514_p11 = scmp.ne.s32.totalorder %s767_s24, %s513_s26  ;;  %p518_p4 = scmp.lt.u32.totalorder %s767_s24, %s811_s2 }
 0x164   : > { %p519_p10 = scmp.lt.u32.totalorder %s517_s6, %s513_s26  ;;  %p521_p13 = scmp.lt.u32.totalorder %s513_s26, %s767_s24 }
 0x165   : > { %p515_p12 = pnand %p514_p11, %p824_p3 }
 0x166   : > { %p520_p6 = por %p519_p10, %p518_p4 }
 0x167   : > { %p516_p2 = pneg %p515_p12 }
 0x168   : > { %p522_p7 = por %p521_p13, %p520_p6 }
 0x16a   : > { %p523_p5 = pnand %p522_p7, %p516_p2 }
 0x16c   : > { %526 = shalt.err (!%p523_p5)
}
 0x16d   : > { %387 = dma.vmem_to_hbm [thread:$0]  (%p824_p3), %s762_s7, 128, %s767_s24, %s260_s17  }
 0x16e PF: > { %s285_s3 = sand.u32 1, %s557_s9   ;;  %p825_p8 = scmp.ne.s32.totalorder %s817_s22, 0 }
 0x16f   : > { %p826_p9 = scmp.ge.s32.totalorder %s569_s12, 2  ;;  %s286_s29 = scalar_lea.sflag [#allocation4], %s285_s3 }
 0x171   : > { %p397_p0 = pnand %p826_p9, %p825_p8 }
 0x173   : > { %552 = dma.done.wait (!%p397_p0), %s286_s29, 128  }
 0x174   : > { %554 = vsyncadd (!%p397_p0), %s286_s29, 4294967168  ;;  %p18_p1 = scmp.ge.s32.totalorder %s615_s15, 4   ;;  %s827_s9 = smov %s561_s10 }
 0x175   : > { %s828_s10 = smov %s565_s11  ;;  %s829_s11 = smov %s627_s18 }
 0x176   : > { %s830_s12 = smov %s615_s15  ;;  %20 = sbr.rel (!%p18_p1) target bundleno = 7 (0x7), region = 86 }
 0x17d   :  { %291 = vsyncpa [#allocation3], 1 }
 0x17e   :  { %293 = vsyncpa [#allocation3 + $0x1], 1 }
 0x17f   :  { %294 = vsyncpa [#allocation6], 1 }
 0x180   :  { %296 = vsyncpa [#allocation6 + $0x1], 1 }
 0x181   :  { %297 = vsyncpa [#allocation4], 1 }
 0x182   :  { %299 = vsyncpa [#allocation4 + $0x1], 1 }

</bundles_post_ra>
